<compile_context>
chip_gen: v6e
topology: v6e:2x2x1
jax: 0.10.0
libtpu: 0.0.40
codegen_flags: <defaults>
</compile_context>

<pallas_src>
import jax
import jax.numpy as jnp
import numpy as np
from jax.experimental import pallas as pl
from jax.experimental.pallas import tpu as pltpu

# --- deterministic TDE constants -------------------------------------------
ALPHA_GAIN = 0.9   # facilitatory (gain) trace decay
ALPHA_EPSC = 0.8   # EPSC trace decay
BETA_MEM = 0.9     # membrane decay
THRESHOLD = 1.0    # spike threshold

# packed output row layout along the sublane axis of the (T, 6, B) output
ROW_CUR_FAC = 0
ROW_CUR_TRIG = 1
ROW_SPK = 2
ROW_GAIN = 3
ROW_EPSC = 4
ROW_MEM = 5
N_ROWS = 6

LANE = 128  # TPU lane width; batch is padded/tiled to multiples of this


def _tde_kernel(w_ref, x_ref, out_ref):
    """TDE kernel over one batch tile.

    w_ref   : SMEM (4,) float32       fc1 weight, row-major flatten of (2, 2)
    x_ref   : VMEM (T, 2, TB) float32 inputs, batch tile on the lane axis
              row 0 = facilitatory channel, row 1 = trigger channel
    out_ref : VMEM (T, 6, TB) float32 packed recordings
    """
    T = x_ref.shape[0]
    TB = x_ref.shape[2]

    # fc1 weights as free scalar reads from SMEM; fc1 runs on the VPU
    # (a 2x2 matmul would pad to a full MXU tile for ~32 MACs).
    w00 = w_ref[0]
    w01 = w_ref[1]
    w10 = w_ref[2]
    w11 = w_ref[3]

    # State lives in vregs across the fully unrolled (static, small T) time
    # loop; all Ref indices below are static.
    # TODO(synk): for T beyond a few dozen steps switch to
    # lax.fori_loop(..., unroll=4..8) carrying (gain, epsc, mem).
    gain = jnp.zeros((1, TB), jnp.float32)
    epsc = jnp.zeros((1, TB), jnp.float32)
    mem = jnp.zeros((1, TB), jnp.float32)

    for t in range(T):
        # Load the two channel rows directly from the ref (no sublane extract).
        x0 = x_ref[t, 0:1, :]          # (1, TB) facilitatory input
        x1 = x_ref[t, 1:2, :]          # (1, TB) trigger input

        # cur1 = x[t] @ W   (transposed layout -> 4 VPU multiply-adds)
        cur_fac = x0 * w00 + x1 * w10
        cur_trig = x0 * w01 + x1 * w11

        # TDE_neuron(1) dynamics
        gain = ALPHA_GAIN * gain + cur_fac
        epsc = ALPHA_EPSC * epsc + gain * cur_trig
        mem = BETA_MEM * mem + epsc
        fired = mem > THRESHOLD
        spk = fired.astype(jnp.float32)
        mem = jnp.where(fired, 0.0, mem)     # reset-to-zero, reuses compare

        # Single lane-dense store per step: one (6, TB) slab.
        out_ref[t] = jnp.concatenate(
            [cur_fac, cur_trig, spk, gain, epsc, mem], axis=0)


@jax.jit
def net_tde_forward(x, w):
    """x: [T, B, 2] float32, w: [2, 2] float32 -> dict of stacked recordings."""
    T, B, C = x.shape
    assert C == 2

    # Layout plumbing in the wrapper: batch on the lane (last) axis, padded to
    # a multiple of 128 so every kernel store/load/DMA is lane-dense.
    B_pad = max(LANE, ((B + LANE - 1) // LANE) * LANE)
    x_t2b = jnp.transpose(x.astype(jnp.float32), (0, 2, 1))         # [T, 2, B]
    x_t2b = jnp.pad(x_t2b, ((0, 0), (0, 0), (0, B_pad - B)))        # [T, 2, B_pad]

    # Batch tile size: multiple of 128, capped so per-block VMEM stays small
    # (double-buffered x + out blocks fit easily in the v7x 32 MiB scoped
    # default; raise vmem_limit_bytes if T grows large).
    TB = min(B_pad, 512)
    assert B_pad % TB == 0
    grid = (B_pad // TB,)

    packed = pl.pallas_call(
        _tde_kernel,
        out_shape=jax.ShapeDtypeStruct((T, N_ROWS, B_pad), jnp.float32),
        grid=grid,
        in_specs=[
            # fc1 weights: 4 scalars in SMEM (flat 1-D to avoid 2-D SMEM padding)
            pl.BlockSpec(memory_space=pltpu.MemorySpace.SMEM),
            # inputs: batch-tiled, auto-pipelined
            pl.BlockSpec((T, 2, TB), lambda i: (0, 0, i)),
        ],
        out_specs=pl.BlockSpec((T, N_ROWS, TB), lambda i: (0, 0, i)),
        compiler_params=pltpu.CompilerParams(
            dimension_semantics=("parallel",)),
    )(w.astype(jnp.float32).reshape(-1), x_t2b)

    # Unpack back to the module-facing [T, B, feat] layout with ONE transpose
    # followed by cheap last-axis slices.
    # TODO(synk): for large B consider emitting bf16 recordings to halve the
    # dominant output HBM traffic.
    tbf = jnp.transpose(packed[:, :, :B], (0, 2, 1))   # [T, B, 6]
    cur = tbf[..., ROW_CUR_FAC:ROW_CUR_TRIG + 1]
    spk = tbf[..., ROW_SPK:ROW_SPK + 1]
    gain = tbf[..., ROW_GAIN:ROW_GAIN + 1]
    epsc = tbf[..., ROW_EPSC:ROW_EPSC + 1]
    mem = tbf[..., ROW_MEM:ROW_MEM + 1]

    return {"cur": [cur], "spks": [spk], "gain": [gain],
            "epsc": [epsc], "mem": [mem]}


def _reference(x, w):
    """Pure-JAX reference of the same dynamics (for correctness check)."""
    def step(carry, x_t):
        gain, epsc, mem = carry
        cur = x_t @ w
        fac, trig = cur[:, 0:1], cur[:, 1:2]
        gain = ALPHA_GAIN * gain + fac
        epsc = ALPHA_EPSC * epsc + gain * trig
        mem = BETA_MEM * mem + epsc
        spk = (mem > THRESHOLD).astype(jnp.float32)
        mem_post = jnp.where(mem > THRESHOLD, 0.0, mem)
        return (gain, epsc, mem_post), (cur, spk, gain, epsc, mem_post)

    B = x.shape[1]
    z = jnp.zeros((B, 1), jnp.float32)
    _, (cur, spk, gain, epsc, mem) = jax.lax.scan(step, (z, z, z), x)
    return cur, spk, gain, epsc, mem


if __name__ == "__main__":
    T, B = 8, 8            # num_steps=8, batch=8, 2 input channels (fac, trig)
    key = jax.random.PRNGKey(0)
    # Spike-like binary inputs, deterministic.
    x = (jax.random.uniform(key, (T, B, 2)) < 0.5).astype(jnp.float32)
    # fc1: eye_conn initialization with gain 1, no bias.
    w = jnp.eye(2, dtype=jnp.float32)

    out = net_tde_forward(x, w)
    jax.block_until_ready(out)

    # sanity check against pure-JAX scan reference
    ref_cur, ref_spk, ref_gain, ref_epsc, ref_mem = _reference(x, w)
    np.testing.assert_allclose(np.asarray(out["cur"][0]), np.asarray(ref_cur), atol=1e-6)
    np.testing.assert_allclose(np.asarray(out["spks"][0]), np.asarray(ref_spk), atol=1e-6)
    np.testing.assert_allclose(np.asarray(out["gain"][0]), np.asarray(ref_gain), atol=1e-6)
    np.testing.assert_allclose(np.asarray(out["epsc"][0]), np.asarray(ref_epsc), atol=1e-6)
    np.testing.assert_allclose(np.asarray(out["mem"][0]), np.asarray(ref_mem), atol=1e-6)

    print("KERNEL_OK")
</pallas_src>

<mosaic_0001>
module attributes {stable_mosaic.version = 11 : i64} {
  func.func @_tde_kernel(%arg0: i32, %arg1: memref<4xf32, #tpu.memory_space<smem>>, %arg2: memref<8x2x128xf32, #tpu.memory_space<vmem>>, %arg3: memref<8x6x128xf32, #tpu.memory_space<vmem>>) attributes {dimension_semantics = [#tpu.dimension_semantics<parallel>], iteration_bounds = array<i64: 1>, scalar_prefetch = 0 : i64, scratch_operands = 0 : i64, tpu.core_type = #tpu.core_type<tc>, window_params = [{transform_indices = @transform_0, window_bounds = array<i64: 4>}, {transform_indices = @transform_1, window_bounds = array<i64: 8, 2, 128>}, {transform_indices = @transform_2, window_bounds = array<i64: 8, 6, 128>}]} {
    %c0 = arith.constant 0 : index
    %0 = memref.load %arg1[%c0] : memref<4xf32, #tpu.memory_space<smem>>
    %c1 = arith.constant 1 : index
    %1 = memref.load %arg1[%c1] : memref<4xf32, #tpu.memory_space<smem>>
    %c2 = arith.constant 2 : index
    %2 = memref.load %arg1[%c2] : memref<4xf32, #tpu.memory_space<smem>>
    %c3 = arith.constant 3 : index
    %3 = memref.load %arg1[%c3] : memref<4xf32, #tpu.memory_space<smem>>
    %cst = arith.constant 0.000000e+00 : f32
    %4 = vector.broadcast %cst : f32 to vector<1x128xf32>
    %cst_0 = arith.constant 0.000000e+00 : f32
    %5 = vector.broadcast %cst_0 : f32 to vector<1x128xf32>
    %cst_1 = arith.constant 0.000000e+00 : f32
    %6 = vector.broadcast %cst_1 : f32 to vector<1x128xf32>
    %c0_2 = arith.constant 0 : index
    %c0_3 = arith.constant 0 : index
    %c0_4 = arith.constant 0 : index
    %7 = vector.load %arg2[%c0_2, %c0_3, %c0_4] : memref<8x2x128xf32, #tpu.memory_space<vmem>>, vector<1x1x128xf32>
    %8 = vector.shape_cast %7 : vector<1x1x128xf32> to vector<1x128xf32>
    %c0_5 = arith.constant 0 : index
    %c1_6 = arith.constant 1 : index
    %c0_7 = arith.constant 0 : index
    %9 = vector.load %arg2[%c0_5, %c1_6, %c0_7] : memref<8x2x128xf32, #tpu.memory_space<vmem>>, vector<1x1x128xf32>
    %10 = vector.shape_cast %9 : vector<1x1x128xf32> to vector<1x128xf32>
    %11 = vector.broadcast %0 : f32 to vector<1x128xf32>
    %12 = arith.mulf %8, %11 : vector<1x128xf32>
    %13 = vector.broadcast %2 : f32 to vector<1x128xf32>
    %14 = arith.mulf %10, %13 : vector<1x128xf32>
    %15 = arith.addf %12, %14 : vector<1x128xf32>
    %16 = vector.broadcast %1 : f32 to vector<1x128xf32>
    %17 = arith.mulf %8, %16 : vector<1x128xf32>
    %18 = vector.broadcast %3 : f32 to vector<1x128xf32>
    %19 = arith.mulf %10, %18 : vector<1x128xf32>
    %20 = arith.addf %17, %19 : vector<1x128xf32>
    %cst_8 = arith.constant 0.899999976 : f32
    %21 = vector.broadcast %cst_8 : f32 to vector<1x128xf32>
    %22 = arith.mulf %21, %4 : vector<1x128xf32>
    %23 = arith.addf %22, %15 : vector<1x128xf32>
    %cst_9 = arith.constant 8.000000e-01 : f32
    %24 = vector.broadcast %cst_9 : f32 to vector<1x128xf32>
    %25 = arith.mulf %24, %5 : vector<1x128xf32>
    %26 = arith.mulf %23, %20 : vector<1x128xf32>
    %27 = arith.addf %25, %26 : vector<1x128xf32>
    %cst_10 = arith.constant 0.899999976 : f32
    %28 = vector.broadcast %cst_10 : f32 to vector<1x128xf32>
    %29 = arith.mulf %28, %6 : vector<1x128xf32>
    %30 = arith.addf %29, %27 : vector<1x128xf32>
    %cst_11 = arith.constant 1.000000e+00 : f32
    %31 = vector.broadcast %cst_11 : f32 to vector<1x128xf32>
    %32 = arith.cmpf ogt, %30, %31 : vector<1x128xf32>
    %33 = arith.extui %32 : vector<1x128xi1> to vector<1x128xi32>
    %34 = arith.sitofp %33 : vector<1x128xi32> to vector<1x128xf32>
    %cst_12 = arith.constant 0.000000e+00 : f32
    %35 = vector.broadcast %cst_12 : f32 to vector<1x128xf32>
    %36 = arith.select %32, %35, %30 : vector<1x128xi1>, vector<1x128xf32>
    %37 = tpu.concatenate %15, %20, %34, %23, %27, %36 in 0 : vector<1x128xf32>, vector<1x128xf32>, vector<1x128xf32>, vector<1x128xf32>, vector<1x128xf32>, vector<1x128xf32> -> vector<6x128xf32>
    %c0_13 = arith.constant 0 : index
    %c0_14 = arith.constant 0 : index
    %c0_15 = arith.constant 0 : index
    %38 = vector.load %arg3[%c0_13, %c0_14, %c0_15] : memref<8x6x128xf32, #tpu.memory_space<vmem>>, vector<1x6x128xf32>
    %39 = vector.shape_cast %38 : vector<1x6x128xf32> to vector<6x128xf32>
    %40 = vector.shape_cast %37 : vector<6x128xf32> to vector<1x6x128xf32>
    tpu.vector_store %arg3[%c0_13, %c0_14, %c0_15], %40 {strides = array<i32>} : memref<8x6x128xf32, #tpu.memory_space<vmem>>, vector<1x6x128xf32>,
    %c1_16 = arith.constant 1 : index
    %c0_17 = arith.constant 0 : index
    %c0_18 = arith.constant 0 : index
    %41 = vector.load %arg2[%c1_16, %c0_17, %c0_18] : memref<8x2x128xf32, #tpu.memory_space<vmem>>, vector<1x1x128xf32>
    %42 = vector.shape_cast %41 : vector<1x1x128xf32> to vector<1x128xf32>
    %c1_19 = arith.constant 1 : index
    %c1_20 = arith.constant 1 : index
    %c0_21 = arith.constant 0 : index
    %43 = vector.load %arg2[%c1_19, %c1_20, %c0_21] : memref<8x2x128xf32, #tpu.memory_space<vmem>>, vector<1x1x128xf32>
    %44 = vector.shape_cast %43 : vector<1x1x128xf32> to vector<1x128xf32>
    %45 = vector.broadcast %0 : f32 to vector<1x128xf32>
    %46 = arith.mulf %42, %45 : vector<1x128xf32>
    %47 = vector.broadcast %2 : f32 to vector<1x128xf32>
    %48 = arith.mulf %44, %47 : vector<1x128xf32>
    %49 = arith.addf %46, %48 : vector<1x128xf32>
    %50 = vector.broadcast %1 : f32 to vector<1x128xf32>
    %51 = arith.mulf %42, %50 : vector<1x128xf32>
    %52 = vector.broadcast %3 : f32 to vector<1x128xf32>
    %53 = arith.mulf %44, %52 : vector<1x128xf32>
    %54 = arith.addf %51, %53 : vector<1x128xf32>
    %cst_22 = arith.constant 0.899999976 : f32
    %55 = vector.broadcast %cst_22 : f32 to vector<1x128xf32>
    %56 = arith.mulf %55, %23 : vector<1x128xf32>
    %57 = arith.addf %56, %49 : vector<1x128xf32>
    %cst_23 = arith.constant 8.000000e-01 : f32
    %58 = vector.broadcast %cst_23 : f32 to vector<1x128xf32>
    %59 = arith.mulf %58, %27 : vector<1x128xf32>
    %60 = arith.mulf %57, %54 : vector<1x128xf32>
    %61 = arith.addf %59, %60 : vector<1x128xf32>
    %cst_24 = arith.constant 0.899999976 : f32
    %62 = vector.broadcast %cst_24 : f32 to vector<1x128xf32>
    %63 = arith.mulf %62, %36 : vector<1x128xf32>
    %64 = arith.addf %63, %61 : vector<1x128xf32>
    %cst_25 = arith.constant 1.000000e+00 : f32
    %65 = vector.broadcast %cst_25 : f32 to vector<1x128xf32>
    %66 = arith.cmpf ogt, %64, %65 : vector<1x128xf32>
    %67 = arith.extui %66 : vector<1x128xi1> to vector<1x128xi32>
    %68 = arith.sitofp %67 : vector<1x128xi32> to vector<1x128xf32>
    %cst_26 = arith.constant 0.000000e+00 : f32
    %69 = vector.broadcast %cst_26 : f32 to vector<1x128xf32>
    %70 = arith.select %66, %69, %64 : vector<1x128xi1>, vector<1x128xf32>
    %71 = tpu.concatenate %49, %54, %68, %57, %61, %70 in 0 : vector<1x128xf32>, vector<1x128xf32>, vector<1x128xf32>, vector<1x128xf32>, vector<1x128xf32>, vector<1x128xf32> -> vector<6x128xf32>
    %c1_27 = arith.constant 1 : index
    %c0_28 = arith.constant 0 : index
    %c0_29 = arith.constant 0 : index
    %72 = vector.load %arg3[%c1_27, %c0_28, %c0_29] : memref<8x6x128xf32, #tpu.memory_space<vmem>>, vector<1x6x128xf32>
    %73 = vector.shape_cast %72 : vector<1x6x128xf32> to vector<6x128xf32>
    %74 = vector.shape_cast %71 : vector<6x128xf32> to vector<1x6x128xf32>
    tpu.vector_store %arg3[%c1_27, %c0_28, %c0_29], %74 {strides = array<i32>} : memref<8x6x128xf32, #tpu.memory_space<vmem>>, vector<1x6x128xf32>,
    %c2_30 = arith.constant 2 : index
    %c0_31 = arith.constant 0 : index
    %c0_32 = arith.constant 0 : index
    %75 = vector.load %arg2[%c2_30, %c0_31, %c0_32] : memref<8x2x128xf32, #tpu.memory_space<vmem>>, vector<1x1x128xf32>
    %76 = vector.shape_cast %75 : vector<1x1x128xf32> to vector<1x128xf32>
    %c2_33 = arith.constant 2 : index
    %c1_34 = arith.constant 1 : index
    %c0_35 = arith.constant 0 : index
    %77 = vector.load %arg2[%c2_33, %c1_34, %c0_35] : memref<8x2x128xf32, #tpu.memory_space<vmem>>, vector<1x1x128xf32>
    %78 = vector.shape_cast %77 : vector<1x1x128xf32> to vector<1x128xf32>
    %79 = vector.broadcast %0 : f32 to vector<1x128xf32>
    %80 = arith.mulf %76, %79 : vector<1x128xf32>
    %81 = vector.broadcast %2 : f32 to vector<1x128xf32>
    %82 = arith.mulf %78, %81 : vector<1x128xf32>
    %83 = arith.addf %80, %82 : vector<1x128xf32>
    %84 = vector.broadcast %1 : f32 to vector<1x128xf32>
    %85 = arith.mulf %76, %84 : vector<1x128xf32>
    %86 = vector.broadcast %3 : f32 to vector<1x128xf32>
    %87 = arith.mulf %78, %86 : vector<1x128xf32>
    %88 = arith.addf %85, %87 : vector<1x128xf32>
    %cst_36 = arith.constant 0.899999976 : f32
    %89 = vector.broadcast %cst_36 : f32 to vector<1x128xf32>
    %90 = arith.mulf %89, %57 : vector<1x128xf32>
    %91 = arith.addf %90, %83 : vector<1x128xf32>
    %cst_37 = arith.constant 8.000000e-01 : f32
    %92 = vector.broadcast %cst_37 : f32 to vector<1x128xf32>
    %93 = arith.mulf %92, %61 : vector<1x128xf32>
    %94 = arith.mulf %91, %88 : vector<1x128xf32>
    %95 = arith.addf %93, %94 : vector<1x128xf32>
    %cst_38 = arith.constant 0.899999976 : f32
    %96 = vector.broadcast %cst_38 : f32 to vector<1x128xf32>
    %97 = arith.mulf %96, %70 : vector<1x128xf32>
    %98 = arith.addf %97, %95 : vector<1x128xf32>
    %cst_39 = arith.constant 1.000000e+00 : f32
    %99 = vector.broadcast %cst_39 : f32 to vector<1x128xf32>
    %100 = arith.cmpf ogt, %98, %99 : vector<1x128xf32>
    %101 = arith.extui %100 : vector<1x128xi1> to vector<1x128xi32>
    %102 = arith.sitofp %101 : vector<1x128xi32> to vector<1x128xf32>
    %cst_40 = arith.constant 0.000000e+00 : f32
    %103 = vector.broadcast %cst_40 : f32 to vector<1x128xf32>
    %104 = arith.select %100, %103, %98 : vector<1x128xi1>, vector<1x128xf32>
    %105 = tpu.concatenate %83, %88, %102, %91, %95, %104 in 0 : vector<1x128xf32>, vector<1x128xf32>, vector<1x128xf32>, vector<1x128xf32>, vector<1x128xf32>, vector<1x128xf32> -> vector<6x128xf32>
    %c2_41 = arith.constant 2 : index
    %c0_42 = arith.constant 0 : index
    %c0_43 = arith.constant 0 : index
    %106 = vector.load %arg3[%c2_41, %c0_42, %c0_43] : memref<8x6x128xf32, #tpu.memory_space<vmem>>, vector<1x6x128xf32>
    %107 = vector.shape_cast %106 : vector<1x6x128xf32> to vector<6x128xf32>
    %108 = vector.shape_cast %105 : vector<6x128xf32> to vector<1x6x128xf32>
    tpu.vector_store %arg3[%c2_41, %c0_42, %c0_43], %108 {strides = array<i32>} : memref<8x6x128xf32, #tpu.memory_space<vmem>>, vector<1x6x128xf32>,
    %c3_44 = arith.constant 3 : index
    %c0_45 = arith.constant 0 : index
    %c0_46 = arith.constant 0 : index
    %109 = vector.load %arg2[%c3_44, %c0_45, %c0_46] : memref<8x2x128xf32, #tpu.memory_space<vmem>>, vector<1x1x128xf32>
    %110 = vector.shape_cast %109 : vector<1x1x128xf32> to vector<1x128xf32>
    %c3_47 = arith.constant 3 : index
    %c1_48 = arith.constant 1 : index
    %c0_49 = arith.constant 0 : index
    %111 = vector.load %arg2[%c3_47, %c1_48, %c0_49] : memref<8x2x128xf32, #tpu.memory_space<vmem>>, vector<1x1x128xf32>
    %112 = vector.shape_cast %111 : vector<1x1x128xf32> to vector<1x128xf32>
    %113 = vector.broadcast %0 : f32 to vector<1x128xf32>
    %114 = arith.mulf %110, %113 : vector<1x128xf32>
    %115 = vector.broadcast %2 : f32 to vector<1x128xf32>
    %116 = arith.mulf %112, %115 : vector<1x128xf32>
    %117 = arith.addf %114, %116 : vector<1x128xf32>
    %118 = vector.broadcast %1 : f32 to vector<1x128xf32>
    %119 = arith.mulf %110, %118 : vector<1x128xf32>
    %120 = vector.broadcast %3 : f32 to vector<1x128xf32>
    %121 = arith.mulf %112, %120 : vector<1x128xf32>
    %122 = arith.addf %119, %121 : vector<1x128xf32>
    %cst_50 = arith.constant 0.899999976 : f32
    %123 = vector.broadcast %cst_50 : f32 to vector<1x128xf32>
    %124 = arith.mulf %123, %91 : vector<1x128xf32>
    %125 = arith.addf %124, %117 : vector<1x128xf32>
    %cst_51 = arith.constant 8.000000e-01 : f32
    %126 = vector.broadcast %cst_51 : f32 to vector<1x128xf32>
    %127 = arith.mulf %126, %95 : vector<1x128xf32>
    %128 = arith.mulf %125, %122 : vector<1x128xf32>
    %129 = arith.addf %127, %128 : vector<1x128xf32>
    %cst_52 = arith.constant 0.899999976 : f32
    %130 = vector.broadcast %cst_52 : f32 to vector<1x128xf32>
    %131 = arith.mulf %130, %104 : vector<1x128xf32>
    %132 = arith.addf %131, %129 : vector<1x128xf32>
    %cst_53 = arith.constant 1.000000e+00 : f32
    %133 = vector.broadcast %cst_53 : f32 to vector<1x128xf32>
    %134 = arith.cmpf ogt, %132, %133 : vector<1x128xf32>
    %135 = arith.extui %134 : vector<1x128xi1> to vector<1x128xi32>
    %136 = arith.sitofp %135 : vector<1x128xi32> to vector<1x128xf32>
    %cst_54 = arith.constant 0.000000e+00 : f32
    %137 = vector.broadcast %cst_54 : f32 to vector<1x128xf32>
    %138 = arith.select %134, %137, %132 : vector<1x128xi1>, vector<1x128xf32>
    %139 = tpu.concatenate %117, %122, %136, %125, %129, %138 in 0 : vector<1x128xf32>, vector<1x128xf32>, vector<1x128xf32>, vector<1x128xf32>, vector<1x128xf32>, vector<1x128xf32> -> vector<6x128xf32>
    %c3_55 = arith.constant 3 : index
    %c0_56 = arith.constant 0 : index
    %c0_57 = arith.constant 0 : index
    %140 = vector.load %arg3[%c3_55, %c0_56, %c0_57] : memref<8x6x128xf32, #tpu.memory_space<vmem>>, vector<1x6x128xf32>
    %141 = vector.shape_cast %140 : vector<1x6x128xf32> to vector<6x128xf32>
    %142 = vector.shape_cast %139 : vector<6x128xf32> to vector<1x6x128xf32>
    tpu.vector_store %arg3[%c3_55, %c0_56, %c0_57], %142 {strides = array<i32>} : memref<8x6x128xf32, #tpu.memory_space<vmem>>, vector<1x6x128xf32>,
    %c4 = arith.constant 4 : index
    %c0_58 = arith.constant 0 : index
    %c0_59 = arith.constant 0 : index
    %143 = vector.load %arg2[%c4, %c0_58, %c0_59] : memref<8x2x128xf32, #tpu.memory_space<vmem>>, vector<1x1x128xf32>
    %144 = vector.shape_cast %143 : vector<1x1x128xf32> to vector<1x128xf32>
    %c4_60 = arith.constant 4 : index
    %c1_61 = arith.constant 1 : index
    %c0_62 = arith.constant 0 : index
    %145 = vector.load %arg2[%c4_60, %c1_61, %c0_62] : memref<8x2x128xf32, #tpu.memory_space<vmem>>, vector<1x1x128xf32>
    %146 = vector.shape_cast %145 : vector<1x1x128xf32> to vector<1x128xf32>
    %147 = vector.broadcast %0 : f32 to vector<1x128xf32>
    %148 = arith.mulf %144, %147 : vector<1x128xf32>
    %149 = vector.broadcast %2 : f32 to vector<1x128xf32>
    %150 = arith.mulf %146, %149 : vector<1x128xf32>
    %151 = arith.addf %148, %150 : vector<1x128xf32>
    %152 = vector.broadcast %1 : f32 to vector<1x128xf32>
    %153 = arith.mulf %144, %152 : vector<1x128xf32>
    %154 = vector.broadcast %3 : f32 to vector<1x128xf32>
    %155 = arith.mulf %146, %154 : vector<1x128xf32>
    %156 = arith.addf %153, %155 : vector<1x128xf32>
    %cst_63 = arith.constant 0.899999976 : f32
    %157 = vector.broadcast %cst_63 : f32 to vector<1x128xf32>
    %158 = arith.mulf %157, %125 : vector<1x128xf32>
    %159 = arith.addf %158, %151 : vector<1x128xf32>
    %cst_64 = arith.constant 8.000000e-01 : f32
    %160 = vector.broadcast %cst_64 : f32 to vector<1x128xf32>
    %161 = arith.mulf %160, %129 : vector<1x128xf32>
    %162 = arith.mulf %159, %156 : vector<1x128xf32>
    %163 = arith.addf %161, %162 : vector<1x128xf32>
    %cst_65 = arith.constant 0.899999976 : f32
    %164 = vector.broadcast %cst_65 : f32 to vector<1x128xf32>
    %165 = arith.mulf %164, %138 : vector<1x128xf32>
    %166 = arith.addf %165, %163 : vector<1x128xf32>
    %cst_66 = arith.constant 1.000000e+00 : f32
    %167 = vector.broadcast %cst_66 : f32 to vector<1x128xf32>
    %168 = arith.cmpf ogt, %166, %167 : vector<1x128xf32>
    %169 = arith.extui %168 : vector<1x128xi1> to vector<1x128xi32>
    %170 = arith.sitofp %169 : vector<1x128xi32> to vector<1x128xf32>
    %cst_67 = arith.constant 0.000000e+00 : f32
    %171 = vector.broadcast %cst_67 : f32 to vector<1x128xf32>
    %172 = arith.select %168, %171, %166 : vector<1x128xi1>, vector<1x128xf32>
    %173 = tpu.concatenate %151, %156, %170, %159, %163, %172 in 0 : vector<1x128xf32>, vector<1x128xf32>, vector<1x128xf32>, vector<1x128xf32>, vector<1x128xf32>, vector<1x128xf32> -> vector<6x128xf32>
    %c4_68 = arith.constant 4 : index
    %c0_69 = arith.constant 0 : index
    %c0_70 = arith.constant 0 : index
    %174 = vector.load %arg3[%c4_68, %c0_69, %c0_70] : memref<8x6x128xf32, #tpu.memory_space<vmem>>, vector<1x6x128xf32>
    %175 = vector.shape_cast %174 : vector<1x6x128xf32> to vector<6x128xf32>
    %176 = vector.shape_cast %173 : vector<6x128xf32> to vector<1x6x128xf32>
    tpu.vector_store %arg3[%c4_68, %c0_69, %c0_70], %176 {strides = array<i32>} : memref<8x6x128xf32, #tpu.memory_space<vmem>>, vector<1x6x128xf32>,
    %c5 = arith.constant 5 : index
    %c0_71 = arith.constant 0 : index
    %c0_72 = arith.constant 0 : index
    %177 = vector.load %arg2[%c5, %c0_71, %c0_72] : memref<8x2x128xf32, #tpu.memory_space<vmem>>, vector<1x1x128xf32>
    %178 = vector.shape_cast %177 : vector<1x1x128xf32> to vector<1x128xf32>
    %c5_73 = arith.constant 5 : index
    %c1_74 = arith.constant 1 : index
    %c0_75 = arith.constant 0 : index
    %179 = vector.load %arg2[%c5_73, %c1_74, %c0_75] : memref<8x2x128xf32, #tpu.memory_space<vmem>>, vector<1x1x128xf32>
    %180 = vector.shape_cast %179 : vector<1x1x128xf32> to vector<1x128xf32>
    %181 = vector.broadcast %0 : f32 to vector<1x128xf32>
    %182 = arith.mulf %178, %181 : vector<1x128xf32>
    %183 = vector.broadcast %2 : f32 to vector<1x128xf32>
    %184 = arith.mulf %180, %183 : vector<1x128xf32>
    %185 = arith.addf %182, %184 : vector<1x128xf32>
    %186 = vector.broadcast %1 : f32 to vector<1x128xf32>
    %187 = arith.mulf %178, %186 : vector<1x128xf32>
    %188 = vector.broadcast %3 : f32 to vector<1x128xf32>
    %189 = arith.mulf %180, %188 : vector<1x128xf32>
    %190 = arith.addf %187, %189 : vector<1x128xf32>
    %cst_76 = arith.constant 0.899999976 : f32
    %191 = vector.broadcast %cst_76 : f32 to vector<1x128xf32>
    %192 = arith.mulf %191, %159 : vector<1x128xf32>
    %193 = arith.addf %192, %185 : vector<1x128xf32>
    %cst_77 = arith.constant 8.000000e-01 : f32
    %194 = vector.broadcast %cst_77 : f32 to vector<1x128xf32>
    %195 = arith.mulf %194, %163 : vector<1x128xf32>
    %196 = arith.mulf %193, %190 : vector<1x128xf32>
    %197 = arith.addf %195, %196 : vector<1x128xf32>
    %cst_78 = arith.constant 0.899999976 : f32
    %198 = vector.broadcast %cst_78 : f32 to vector<1x128xf32>
    %199 = arith.mulf %198, %172 : vector<1x128xf32>
    %200 = arith.addf %199, %197 : vector<1x128xf32>
    %cst_79 = arith.constant 1.000000e+00 : f32
    %201 = vector.broadcast %cst_79 : f32 to vector<1x128xf32>
    %202 = arith.cmpf ogt, %200, %201 : vector<1x128xf32>
    %203 = arith.extui %202 : vector<1x128xi1> to vector<1x128xi32>
    %204 = arith.sitofp %203 : vector<1x128xi32> to vector<1x128xf32>
    %cst_80 = arith.constant 0.000000e+00 : f32
    %205 = vector.broadcast %cst_80 : f32 to vector<1x128xf32>
    %206 = arith.select %202, %205, %200 : vector<1x128xi1>, vector<1x128xf32>
    %207 = tpu.concatenate %185, %190, %204, %193, %197, %206 in 0 : vector<1x128xf32>, vector<1x128xf32>, vector<1x128xf32>, vector<1x128xf32>, vector<1x128xf32>, vector<1x128xf32> -> vector<6x128xf32>
    %c5_81 = arith.constant 5 : index
    %c0_82 = arith.constant 0 : index
    %c0_83 = arith.constant 0 : index
    %208 = vector.load %arg3[%c5_81, %c0_82, %c0_83] : memref<8x6x128xf32, #tpu.memory_space<vmem>>, vector<1x6x128xf32>
    %209 = vector.shape_cast %208 : vector<1x6x128xf32> to vector<6x128xf32>
    %210 = vector.shape_cast %207 : vector<6x128xf32> to vector<1x6x128xf32>
    tpu.vector_store %arg3[%c5_81, %c0_82, %c0_83], %210 {strides = array<i32>} : memref<8x6x128xf32, #tpu.memory_space<vmem>>, vector<1x6x128xf32>,
    %c6 = arith.constant 6 : index
    %c0_84 = arith.constant 0 : index
    %c0_85 = arith.constant 0 : index
    %211 = vector.load %arg2[%c6, %c0_84, %c0_85] : memref<8x2x128xf32, #tpu.memory_space<vmem>>, vector<1x1x128xf32>
    %212 = vector.shape_cast %211 : vector<1x1x128xf32> to vector<1x128xf32>
    %c6_86 = arith.constant 6 : index
    %c1_87 = arith.constant 1 : index
    %c0_88 = arith.constant 0 : index
    %213 = vector.load %arg2[%c6_86, %c1_87, %c0_88] : memref<8x2x128xf32, #tpu.memory_space<vmem>>, vector<1x1x128xf32>
    %214 = vector.shape_cast %213 : vector<1x1x128xf32> to vector<1x128xf32>
    %215 = vector.broadcast %0 : f32 to vector<1x128xf32>
    %216 = arith.mulf %212, %215 : vector<1x128xf32>
    %217 = vector.broadcast %2 : f32 to vector<1x128xf32>
    %218 = arith.mulf %214, %217 : vector<1x128xf32>
    %219 = arith.addf %216, %218 : vector<1x128xf32>
    %220 = vector.broadcast %1 : f32 to vector<1x128xf32>
    %221 = arith.mulf %212, %220 : vector<1x128xf32>
    %222 = vector.broadcast %3 : f32 to vector<1x128xf32>
    %223 = arith.mulf %214, %222 : vector<1x128xf32>
    %224 = arith.addf %221, %223 : vector<1x128xf32>
    %cst_89 = arith.constant 0.899999976 : f32
    %225 = vector.broadcast %cst_89 : f32 to vector<1x128xf32>
    %226 = arith.mulf %225, %193 : vector<1x128xf32>
    %227 = arith.addf %226, %219 : vector<1x128xf32>
    %cst_90 = arith.constant 8.000000e-01 : f32
    %228 = vector.broadcast %cst_90 : f32 to vector<1x128xf32>
    %229 = arith.mulf %228, %197 : vector<1x128xf32>
    %230 = arith.mulf %227, %224 : vector<1x128xf32>
    %231 = arith.addf %229, %230 : vector<1x128xf32>
    %cst_91 = arith.constant 0.899999976 : f32
    %232 = vector.broadcast %cst_91 : f32 to vector<1x128xf32>
    %233 = arith.mulf %232, %206 : vector<1x128xf32>
    %234 = arith.addf %233, %231 : vector<1x128xf32>
    %cst_92 = arith.constant 1.000000e+00 : f32
    %235 = vector.broadcast %cst_92 : f32 to vector<1x128xf32>
    %236 = arith.cmpf ogt, %234, %235 : vector<1x128xf32>
    %237 = arith.extui %236 : vector<1x128xi1> to vector<1x128xi32>
    %238 = arith.sitofp %237 : vector<1x128xi32> to vector<1x128xf32>
    %cst_93 = arith.constant 0.000000e+00 : f32
    %239 = vector.broadcast %cst_93 : f32 to vector<1x128xf32>
    %240 = arith.select %236, %239, %234 : vector<1x128xi1>, vector<1x128xf32>
    %241 = tpu.concatenate %219, %224, %238, %227, %231, %240 in 0 : vector<1x128xf32>, vector<1x128xf32>, vector<1x128xf32>, vector<1x128xf32>, vector<1x128xf32>, vector<1x128xf32> -> vector<6x128xf32>
    %c6_94 = arith.constant 6 : index
    %c0_95 = arith.constant 0 : index
    %c0_96 = arith.constant 0 : index
    %242 = vector.load %arg3[%c6_94, %c0_95, %c0_96] : memref<8x6x128xf32, #tpu.memory_space<vmem>>, vector<1x6x128xf32>
    %243 = vector.shape_cast %242 : vector<1x6x128xf32> to vector<6x128xf32>
    %244 = vector.shape_cast %241 : vector<6x128xf32> to vector<1x6x128xf32>
    tpu.vector_store %arg3[%c6_94, %c0_95, %c0_96], %244 {strides = array<i32>} : memref<8x6x128xf32, #tpu.memory_space<vmem>>, vector<1x6x128xf32>,
    %c7 = arith.constant 7 : index
    %c0_97 = arith.constant 0 : index
    %c0_98 = arith.constant 0 : index
    %245 = vector.load %arg2[%c7, %c0_97, %c0_98] : memref<8x2x128xf32, #tpu.memory_space<vmem>>, vector<1x1x128xf32>
    %246 = vector.shape_cast %245 : vector<1x1x128xf32> to vector<1x128xf32>
    %c7_99 = arith.constant 7 : index
    %c1_100 = arith.constant 1 : index
    %c0_101 = arith.constant 0 : index
    %247 = vector.load %arg2[%c7_99, %c1_100, %c0_101] : memref<8x2x128xf32, #tpu.memory_space<vmem>>, vector<1x1x128xf32>
    %248 = vector.shape_cast %247 : vector<1x1x128xf32> to vector<1x128xf32>
    %249 = vector.broadcast %0 : f32 to vector<1x128xf32>
    %250 = arith.mulf %246, %249 : vector<1x128xf32>
    %251 = vector.broadcast %2 : f32 to vector<1x128xf32>
    %252 = arith.mulf %248, %251 : vector<1x128xf32>
    %253 = arith.addf %250, %252 : vector<1x128xf32>
    %254 = vector.broadcast %1 : f32 to vector<1x128xf32>
    %255 = arith.mulf %246, %254 : vector<1x128xf32>
    %256 = vector.broadcast %3 : f32 to vector<1x128xf32>
    %257 = arith.mulf %248, %256 : vector<1x128xf32>
    %258 = arith.addf %255, %257 : vector<1x128xf32>
    %cst_102 = arith.constant 0.899999976 : f32
    %259 = vector.broadcast %cst_102 : f32 to vector<1x128xf32>
    %260 = arith.mulf %259, %227 : vector<1x128xf32>
    %261 = arith.addf %260, %253 : vector<1x128xf32>
    %cst_103 = arith.constant 8.000000e-01 : f32
    %262 = vector.broadcast %cst_103 : f32 to vector<1x128xf32>
    %263 = arith.mulf %262, %231 : vector<1x128xf32>
    %264 = arith.mulf %261, %258 : vector<1x128xf32>
    %265 = arith.addf %263, %264 : vector<1x128xf32>
    %cst_104 = arith.constant 0.899999976 : f32
    %266 = vector.broadcast %cst_104 : f32 to vector<1x128xf32>
    %267 = arith.mulf %266, %240 : vector<1x128xf32>
    %268 = arith.addf %267, %265 : vector<1x128xf32>
    %cst_105 = arith.constant 1.000000e+00 : f32
    %269 = vector.broadcast %cst_105 : f32 to vector<1x128xf32>
    %270 = arith.cmpf ogt, %268, %269 : vector<1x128xf32>
    %271 = arith.extui %270 : vector<1x128xi1> to vector<1x128xi32>
    %272 = arith.sitofp %271 : vector<1x128xi32> to vector<1x128xf32>
    %cst_106 = arith.constant 0.000000e+00 : f32
    %273 = vector.broadcast %cst_106 : f32 to vector<1x128xf32>
    %274 = arith.select %270, %273, %268 : vector<1x128xi1>, vector<1x128xf32>
    %275 = tpu.concatenate %253, %258, %272, %261, %265, %274 in 0 : vector<1x128xf32>, vector<1x128xf32>, vector<1x128xf32>, vector<1x128xf32>, vector<1x128xf32>, vector<1x128xf32> -> vector<6x128xf32>
    %c7_107 = arith.constant 7 : index
    %c0_108 = arith.constant 0 : index
    %c0_109 = arith.constant 0 : index
    %276 = vector.load %arg3[%c7_107, %c0_108, %c0_109] : memref<8x6x128xf32, #tpu.memory_space<vmem>>, vector<1x6x128xf32>
    %277 = vector.shape_cast %276 : vector<1x6x128xf32> to vector<6x128xf32>
    %278 = vector.shape_cast %275 : vector<6x128xf32> to vector<1x6x128xf32>
    tpu.vector_store %arg3[%c7_107, %c0_108, %c0_109], %278 {strides = array<i32>} : memref<8x6x128xf32, #tpu.memory_space<vmem>>, vector<1x6x128xf32>,
    return
  }
  func.func @transform_0(%arg0: i32) -> i32 {
    %c0_i32 = arith.constant 0 : i32
    %c0_i32_0 = arith.constant 0 : i32
    return %c0_i32 : i32
  }
  func.func @transform_1(%arg0: i32) -> (i32, i32, i32) {
    %c0_i32 = arith.constant 0 : i32
    %c0_i32_0 = arith.constant 0 : i32
    %c0_i32_1 = arith.constant 0 : i32
    return %c0_i32, %c0_i32_0, %arg0 : i32, i32, i32
  }
  func.func @transform_2(%arg0: i32) -> (i32, i32, i32) {
    %c0_i32 = arith.constant 0 : i32
    %c0_i32_0 = arith.constant 0 : i32
    %c0_i32_1 = arith.constant 0 : i32
    return %c0_i32, %c0_i32_0, %arg0 : i32, i32, i32
  }
}

</mosaic_0001>

<bundles_post_ra>
// kernel: net_tde_forward.1
= control target key start
LH: loop header
LB: loop body
LE: loop exit
PB: predicated region body
PF: predicated region fallthrough
CT: control target
= control target key end

     0   :  { %7 = vsyncpa [#allocation3], 0  ;;  %s615_s0 = inlined_call_operand.vmem [shape: f32[4], index: 0, kind: input, shape index: {}]   ;;  %s616_s1 = inlined_call_operand.vmem [shape: f32[8,2,128], index: 1, kind: input, shape index: {}]   ;;  %s617_s2 = inlined_call_operand.vmem [shape: f32[8,6,128], index: 2, kind: output, shape index: {}]  }
   0x1   :  { %s14_s11 = sshll.u32 %s615_s0, 4  ;;  %s15_s11 = int_to_ptr.vmem [resolvable:$true] %s14_s11 }
   0x2   :  { %s407_s12 = scalar_lea.vmem %s15_s11, 16  ;;  %p412_p1 = scmp.lt.s32.totalorder %s15_s11, %s15_s11 }
   0x3   :  { %p408_p0 = scmp.ne.s32.totalorder %s15_s11, %s407_s12  ;;  %p413_p2 = scmp.lt.s32.totalorder %s407_s12, %s407_s12 }
   0x5   :  { %p414_p3 = por %p413_p2, %p412_p1 }
   0x7   :  { %p415_p4 = pnand %p414_p3, %p408_p0 }
   0x9   :  { %418 = shalt.err (!%p415_p4)
}
   0xa   :  { %s421_s13 = smov [#allocation2]  }
   0xb   :  { %17 = dma.vmem_to_smem %s15_s11, 16, %s421_s13, [#allocation3]  }
   0xc   :  { %419 = dma.done.wait [#allocation3], 16  }
   0xd   :  { %420 = vsyncadd [#allocation3], 4294967280 }
   0xe   :  { %23 = sfence }
   0xf   :  { %s24_s14 = sld [smem:[#allocation2]]  ;;  %v28_v0 = vld [vmem:[%s616_s1] sm:$0x1]  ;;  %v377_v1 = vld [vmem:[%s616_s1 + $0x2] sm:$0x1]  ;;  %vm63_vm0 = vcmask 1040384  }
  0x10   :  { %s373_s15 = sld [smem:[#allocation2 + $0x1]]  ;;  %v381_v2 = vld [vmem:[%s616_s1 + $0x4] sm:$0x1]  ;;  %v29_v3 = vld [vmem:[%s616_s1 + $0x1] sm:$0x1]  ;;  %vm65_vm1 = vcmask 1041408  }
  0x11   :  { %s374_s16 = sld [smem:[#allocation2 + $0x2]]  ;;  %v378_v5 = vld [vmem:[%s616_s1 + $0x3] sm:$0x1]  ;;  %v382_v9 = vld [vmem:[%s616_s1 + $0x5] sm:$0x1]  ;;  %vm67_vm2 = vcmask 1042432  }
  0x12   :  { %s375_s17 = sld [smem:[#allocation2 + $0x3]]  ;;  %v385_v14 = vld [vmem:[%s616_s1 + $0x6] sm:$0x1]  ;;  %v386_v15 = vld [vmem:[%s616_s1 + $0x7] sm:$0x1]  ;;  %vm69_vm3 = vcmask 1043456  }
  0x13   :  { %vm71_vm4 = vcmask 1044480   ;;  %v389_v41 = vld [vmem:[%s616_s1 + $0x8] sm:$0x1]  ;;  %v390_v45 = vld [vmem:[%s616_s1 + $0x9] sm:$0x1]  ;;  %v422_v46 = vmov 0.0  }
  0x15   :  { %v453_v4 = vstv %s24_s14 }
  0x16   :  { %v31_v6 = vmul.f32 %v453_v4, %v28_v0  ;;  %v459_v7 = vstv %s373_s15  ;;  %v77_v8 = vmul.f32 %v377_v1, %v453_v4  ;;  %v119_v13 = vmul.f32 %v381_v2, %v453_v4 }
  0x17   :  { %v465_v10 = vstv %s374_s16  ;;  %v36_v11 = vmul.f32 %v459_v7, %v28_v0  ;;  %v80_v12 = vmul.f32 %v377_v1, %v459_v7  ;;  %v122_v19 = vmul.f32 %v381_v2, %v459_v7 }
  0x18   :  { %v33_v16 = vmul.f32 %v465_v10, %v29_v3  ;;  %v477_v17 = vstv %s375_s17  ;;  %v78_v18 = vmul.f32 %v378_v5, %v465_v10  ;;  %v120_v22 = vmul.f32 %v382_v9, %v465_v10 }
  0x19   :  { %v38_v20 = vmul.f32 %v477_v17, %v29_v3  ;;  %v81_v21 = vmul.f32 %v378_v5, %v477_v17  ;;  %v123_v23 = vmul.f32 %v382_v9, %v477_v17  ;;  %v161_v26 = vmul.f32 %v385_v14, %v453_v4 }
  0x1a   :  { %v34_v24 = vadd.f32 %v33_v16, %v31_v6  ;;  %v79_v25 = vadd.f32 %v78_v18, %v77_v8  ;;  %v162_v27 = vmul.f32 %v386_v15, %v465_v10  ;;  %v164_v29 = vmul.f32 %v385_v14, %v459_v7 }
  0x1b   :  { %v39_v28 = vadd.f32 %v38_v20, %v36_v11  ;;  %v82_v30 = vadd.f32 %v81_v21, %v80_v12  ;;  %v165_v32 = vmul.f32 %v386_v15, %v477_v17  ;;  %v121_v35 = vadd.f32 %v120_v22, %v119_v13  ;;  %v393_v13 = vld [vmem:[%s616_s1 + $0xa] sm:$0x1] }
  0x1c   :  { %v83_v31 = vmul.f32 0.9, %v34_v24  ;;  %v124_v36 = vadd.f32 %v123_v23, %v122_v19  ;;  %v55_v37 = vrot.slane %v34_v24, 5  ;;  %v163_v40 = vadd.f32 %v162_v27, %v161_v26  ;;  %v394_v23 = vld [vmem:[%s616_s1 + $0xb] sm:$0x1] }
  0x1d   :  { %v41_v33 = vmul.f32 %v39_v28, %v34_v24  ;;  %v49_v34 = vrot.slane %v39_v28, 7  ;;  %v95_v39 = vrot.slane %v82_v30, 7  ;;  %v166_v44 = vadd.f32 %v165_v32, %v164_v29 }
  0x1e   :  { %v84_v38 = vadd.f32 %v83_v31, %v79_v25  ;;  %v137_v43 = vrot.slane %v124_v36, 7  ;;  %v203_v54 = vmul.f32 %v389_v41, %v453_v4  ;;  %v204_v58 = vmul.f32 %v390_v45, %v465_v10 }
  0x1f   :  { %vm44_vm5 = vcmp.gt.f32.partialorder %v41_v33, 1.0  ;;  %v85_v42 = vmul.f32 0.8, %v41_v33  ;;  %v64_v49 = vsel %vm63_vm0, %v34_v24, %v49_v34  ;;  %v58_v52 = vrot.slane %v41_v33, 4 }
  0x20   :  { %v376_v47 = vsel %vm44_vm5, 1.0, %v422_v46  ;;  %v47_v48 = vsel %vm44_vm5, 0.0, %v41_v33  ;;  %v86_v50 = vmul.f32 %v84_v38, %v82_v30  ;;  %v125_v57 = vmul.f32 0.9, %v84_v38 }
  0x21   :  { %v52_v51 = vrot.slane %v376_v47, 6  ;;  %v88_v53 = vmul.f32 0.9, %v47_v48  ;;  %v61_v55 = vrot.slane %v47_v48, 3  ;;  %v101_v60 = vrot.slane %v84_v38, 5 }
  0x22   :  { %v87_v56 = vadd.f32 %v86_v50, %v85_v42  ;;  %v109_v61 = vsel %vm63_vm0, %v79_v25, %v95_v39  ;;  %v151_v62 = vsel %vm63_vm0, %v121_v35, %v137_v43  ;;  %v126_v1 = vadd.f32 %v125_v57, %v121_v35  ;;  %v397_v48 = vld [vmem:[%s616_s1 + $0xc] sm:$0x1] }
  0x23   :  { %v66_v59 = vsel %vm65_vm1, %v64_v49, %v52_v51  ;;  %v179_v2 = vrot.slane %v166_v44, 7  ;;  %v206_v6 = vmul.f32 %v389_v41, %v459_v7  ;;  %v207_v8 = vmul.f32 %v390_v45, %v477_v17 }
  0x24   :  { %v68_v63 = vsel %vm67_vm2, %v66_v59, %v55_v37  ;;  %v89_v0 = vadd.f32 %v88_v53, %v87_v56  ;;  %v127_v5 = vmul.f32 0.8, %v87_v56  ;;  %v128_v11 = vmul.f32 %v126_v1, %v124_v36  ;;  %v398_v53 = vld [vmem:[%s616_s1 + $0xd] sm:$0x1] }
  0x25   :  { %v70_v3 = vsel %vm69_vm3, %v68_v63, %v58_v52  ;;  %v507_v12 = vadd.f32 %v204_v58, %v203_v54  ;;  %v104_v16 = vrot.slane %v87_v56, 4  ;;  %v167_v18 = vmul.f32 0.9, %v126_v1 }
  0x26   :  { %v72_v9 = vsel %vm71_vm4, %v70_v3, %v61_v55  ;;  %vm90_vm6 = vcmp.gt.f32.partialorder %v89_v0, 1.0  ;;  %v129_v21 = vadd.f32 %v128_v11, %v127_v5  ;;  %v193_v22 = vsel %vm63_vm0, %v163_v40, %v179_v2 }
  0x27   :  { %73 = vst [vmem:[%s617_s2] sm:$0x3f] %v72_v9  ;;  %v379_v14 = vsel %vm90_vm6, 1.0, %v422_v46  ;;  %v93_v15 = vsel %vm90_vm6, 0.0, %v89_v0  ;;  %v143_v25 = vrot.slane %v126_v1, 5  ;;  %v168_v26 = vadd.f32 %v167_v18, %v163_v40 }
  0x28   :  { %v98_v19 = vrot.slane %v379_v14, 6  ;;  %v130_v20 = vmul.f32 0.9, %v93_v15  ;;  %v107_v24 = vrot.slane %v93_v15, 3  ;;  %v208_v27 = vadd.f32 %v207_v8, %v206_v6 }
  0x29   :  { %v169_v30 = vmul.f32 0.8, %v129_v21  ;;  %v245_v31 = vmul.f32 %v393_v13, %v453_v4  ;;  %v170_v33 = vmul.f32 %v168_v26, %v166_v44  ;;  %v209_v34 = vmul.f32 0.9, %v168_v26 }
  0x2a   :  { %v110_v28 = vsel %vm65_vm1, %v109_v61, %v98_v19  ;;  %v131_v29 = vadd.f32 %v130_v20, %v129_v21  ;;  %v246_v35 = vmul.f32 %v394_v23, %v465_v10  ;;  %v221_v37 = vrot.slane %v208_v27, 7 }
  0x2b   :  { %v111_v32 = vsel %vm67_vm2, %v110_v28, %v101_v60  ;;  %v248_v38 = vmul.f32 %v393_v13, %v459_v7  ;;  %v171_v42 = vadd.f32 %v170_v33, %v169_v30  ;;  %v146_v44 = vrot.slane %v129_v21, 4 }
  0x2c   :  { %v112_v36 = vsel %vm69_vm3, %v111_v32, %v104_v16  ;;  %vm132_vm7 = vcmp.gt.f32.partialorder %v131_v29, 1.0  ;;  %v532_v47 = vadd.f32 %v209_v34, %v507_v12  ;;  %v247_v51 = vadd.f32 %v246_v35, %v245_v31 }
  0x2d   :  { %v113_v39 = vsel %vm71_vm4, %v112_v36, %v107_v24  ;;  %v383_v40 = vsel %vm132_vm7, 1.0, %v422_v46  ;;  %v135_v41 = vsel %vm132_vm7, 0.0, %v131_v29  ;;  %v211_v50 = vmul.f32 0.8, %v171_v42  ;;  %v402_v29 = vld [vmem:[%s616_s1 + $0xf] sm:$0x1] }
  0x2e   :  { %380 = vst [vmem:[%s617_s2 + $0x8] sm:$0x3f] %v113_v39  ;;  %v140_v43 = vrot.slane %v383_v40, 6  ;;  %v172_v45 = vmul.f32 0.9, %v135_v41  ;;  %v149_v49 = vrot.slane %v135_v41, 3  ;;  %v249_v52 = vmul.f32 %v394_v23, %v477_v17 }
  0x2f   :  { %v185_v56 = vrot.slane %v168_v26, 5  ;;  %v212_v57 = vmul.f32 %v532_v47, %v208_v27  ;;  %v251_v60 = vmul.f32 0.9, %v532_v47  ;;  %v287_v61 = vmul.f32 %v397_v48, %v453_v4  ;;  %v401_v23 = vld [vmem:[%s616_s1 + $0xe] sm:$0x1] }
  0x30   :  { %v152_v54 = vsel %vm65_vm1, %v151_v62, %v140_v43  ;;  %v173_v55 = vadd.f32 %v172_v45, %v171_v42  ;;  %v250_v59 = vadd.f32 %v249_v52, %v248_v38  ;;  %v288_v1 = vmul.f32 %v398_v53, %v465_v10 }
  0x31   :  { %v153_v58 = vsel %vm67_vm2, %v152_v54, %v143_v25  ;;  %v213_v0 = vadd.f32 %v212_v57, %v211_v50  ;;  %v550_v5 = vadd.f32 %v251_v60, %v247_v51  ;;  %v188_v8 = vrot.slane %v171_v42, 4 }
  0x32   :  { %v154_v63 = vsel %vm69_vm3, %v153_v58, %v146_v44  ;;  %vm174_vm8 = vcmp.gt.f32.partialorder %v173_v55, 1.0  ;;  %v290_v11 = vmul.f32 %v397_v48, %v459_v7  ;;  %v235_v14 = vsel %vm63_vm0, %v507_v12, %v221_v37 }
  0x33   :  { %v155_v2 = vsel %vm71_vm4, %v154_v63, %v149_v49  ;;  %v387_v62 = vsel %vm174_vm8, 1.0, %v422_v46  ;;  %v177_v3 = vsel %vm174_vm8, 0.0, %v173_v55  ;;  %v253_v15 = vmul.f32 0.8, %v213_v0 }
  0x34   :  { %384 = vst [vmem:[%s617_s2 + $0x10] sm:$0x3f] %v155_v2  ;;  %v182_v6 = vrot.slane %v387_v62, 6  ;;  %v214_v9 = vmul.f32 0.9, %v177_v3  ;;  %v191_v13 = vrot.slane %v177_v3, 3  ;;  %v254_v16 = vmul.f32 %v550_v5, %v250_v59 }
  0x35   :  { %v289_v20 = vadd.f32 %v288_v1, %v287_v61  ;;  %v291_v21 = vmul.f32 %v398_v53, %v477_v17  ;;  %v227_v25 = vrot.slane %v532_v47, 5  ;;  %v263_v26 = vrot.slane %v250_v59, 7 }
  0x36   :  { %v194_v18 = vsel %vm65_vm1, %v193_v22, %v182_v6  ;;  %v215_v19 = vadd.f32 %v214_v9, %v213_v0  ;;  %v293_v12 = vmul.f32 0.9, %v550_v5  ;;  %v255_v28 = vadd.f32 %v254_v16, %v253_v15 }
  0x37   :  { %v195_v24 = vsel %vm67_vm2, %v194_v18, %v185_v56  ;;  %v292_v22 = vadd.f32 %v291_v21, %v290_v11  ;;  %v329_v33 = vmul.f32 %v401_v23, %v453_v4  ;;  %v230_v35 = vrot.slane %v213_v0, 4 }
  0x38   :  { %v196_v27 = vsel %vm69_vm3, %v195_v24, %v188_v8  ;;  %vm216_vm9 = vcmp.gt.f32.partialorder %v215_v19, 1.0  ;;  %v294_v37 = vadd.f32 %v293_v12, %v289_v20  ;;  %v295_v39 = vmul.f32 0.8, %v255_v28 }
  0x39   :  { %v197_v30 = vsel %vm71_vm4, %v196_v27, %v191_v13  ;;  %v391_v31 = vsel %vm216_vm9, 1.0, %v422_v46  ;;  %v219_v32 = vsel %vm216_vm9, 0.0, %v215_v19  ;;  %v330_v40 = vmul.f32 %v402_v29, %v465_v10 }
  0x3a   :  { %388 = vst [vmem:[%s617_s2 + $0x18] sm:$0x3f] %v197_v30  ;;  %v224_v34 = vrot.slane %v391_v31, 6  ;;  %v256_v36 = vmul.f32 0.9, %v219_v32  ;;  %v233_v38 = vrot.slane %v219_v32, 3  ;;  %v332_v41 = vmul.f32 %v401_v23, %v459_v7 }
  0x3b   :  { %v269_v44 = vrot.slane %v550_v5, 5  ;;  %v296_v4 = vmul.f32 %v294_v37, %v292_v22  ;;  %v277_v47 = vsel %vm63_vm0, %v247_v51, %v263_v26  ;;  %v331_v48 = vadd.f32 %v330_v40, %v329_v33 }
  0x3c   :  { %v236_v42 = vsel %vm65_vm1, %v235_v14, %v224_v34  ;;  %v257_v43 = vadd.f32 %v256_v36, %v255_v28  ;;  %v333_v49 = vmul.f32 %v402_v29, %v477_v17  ;;  %v335_v10 = vmul.f32 0.9, %v294_v37 }
  0x3d   :  { %v237_v45 = vsel %vm67_vm2, %v236_v42, %v227_v25  ;;  %v297_v52 = vadd.f32 %v296_v4, %v295_v39  ;;  %v272_v51 = vrot.slane %v255_v28, 4  ;;  %v305_v58 = vrot.slane %v292_v22, 7 }
  0x3e   :  { %v238_v50 = vsel %vm69_vm3, %v237_v45, %v230_v35  ;;  %vm258_vm10 = vcmp.gt.f32.partialorder %v257_v43, 1.0  ;;  %v334_v55 = vadd.f32 %v333_v49, %v332_v41  ;;  %v336_v59 = vadd.f32 %v335_v10, %v331_v48 }
  0x3f   :  { %v239_v7 = vsel %vm71_vm4, %v238_v50, %v233_v38  ;;  %v395_v53 = vsel %vm258_vm10, 1.0, %v422_v46  ;;  %v261_v54 = vsel %vm258_vm10, 0.0, %v257_v43  ;;  %v337_v60 = vmul.f32 0.8, %v297_v52 }
  0x40   :  { %392 = vst [vmem:[%s617_s2 + $0x20] sm:$0x3f] %v239_v7  ;;  %v266_v56 = vrot.slane %v395_v53, 6  ;;  %v298_v57 = vmul.f32 0.9, %v261_v54  ;;  %v275_v17 = vrot.slane %v261_v54, 3  ;;  %v338_v1 = vmul.f32 %v336_v59, %v334_v55 }
  0x41   :  { %v311_v62 = vrot.slane %v294_v37, 5  ;;  %v319_v3 = vsel %vm63_vm0, %v289_v20, %v305_v58  ;;  %v314_v13 = vrot.slane %v297_v52, 4  ;;  %v347_v16 = vrot.slane %v334_v55, 7 }
  0x42   :  { %v278_v61 = vsel %vm65_vm1, %v277_v47, %v266_v56  ;;  %v299_v63 = vadd.f32 %v298_v57, %v297_v52  ;;  %v339_v9 = vadd.f32 %v338_v1, %v337_v60  ;;  %v353_v23 = vrot.slane %v336_v59, 5 }
  0x43   :  { %v279_v0 = vsel %vm67_vm2, %v278_v61, %v269_v44  ;;  %v361_v12 = vsel %vm63_vm0, %v331_v48, %v347_v16 }
  0x44   :  { %v280_v2 = vsel %vm69_vm3, %v279_v0, %v272_v51  ;;  %vm300_vm11 = vcmp.gt.f32.partialorder %v299_v63, 1.0  ;;  %v356_v28 = vrot.slane %v339_v9, 4 }
  0x45   :  { %v281_v5 = vsel %vm71_vm4, %v280_v2, %v275_v17  ;;  %v399_v6 = vsel %vm300_vm11, 1.0, %v422_v46  ;;  %v303_v8 = vsel %vm300_vm11, 0.0, %v299_v63 }
  0x46   :  { %396 = vst [vmem:[%s617_s2 + $0x28] sm:$0x3f] %v281_v5  ;;  %v308_v11 = vrot.slane %v399_v6, 6  ;;  %v340_v14 = vmul.f32 0.9, %v303_v8  ;;  %v317_v15 = vrot.slane %v303_v8, 3 }
  0x48   :  { %v320_v18 = vsel %vm65_vm1, %v319_v3, %v308_v11  ;;  %v341_v19 = vadd.f32 %v340_v14, %v339_v9 }
  0x49   :  { %v321_v20 = vsel %vm67_vm2, %v320_v18, %v311_v62 }
  0x4a   :  { %v322_v21 = vsel %vm69_vm3, %v321_v20, %v314_v13  ;;  %vm342_vm12 = vcmp.gt.f32.partialorder %v341_v19, 1.0 }
  0x4b   :  { %v323_v24 = vsel %vm71_vm4, %v322_v21, %v317_v15  ;;  %v403_v25 = vsel %vm342_vm12, 1.0, %v422_v46  ;;  %v345_v26 = vsel %vm342_vm12, 0.0, %v341_v19 }
  0x4c   :  { %400 = vst [vmem:[%s617_s2 + $0x30] sm:$0x3f] %v323_v24  ;;  %v350_v27 = vrot.slane %v403_v25, 6  ;;  %v359_v22 = vrot.slane %v345_v26, 3 }
  0x4e   :  { %v362_v29 = vsel %vm65_vm1, %v361_v12, %v350_v27 }
  0x4f   :  { %v363_v30 = vsel %vm67_vm2, %v362_v29, %v353_v23 }
  0x50   :  { %v364_v31 = vsel %vm69_vm3, %v363_v30, %v356_v28 }
  0x51   :  { %v365_v32 = vsel %vm71_vm4, %v364_v31, %v359_v22 }
  0x52   :  { %404 = vst [vmem:[%s617_s2 + $0x38] sm:$0x3f] %v365_v32 }
  0x53   :  { %372 = vsyncpa [#allocation3], 1 }

</bundles_post_ra>
